<compile_context>
chip_gen: v7x
topology: tpu7x:2x2x1
jax: 0.10.0
libtpu: 0.0.40
codegen_flags: <defaults>
</compile_context>

<pallas_src>
import functools

import numpy as np
import jax
import jax.numpy as jnp
from jax.experimental import pallas as pl
from jax.experimental.pallas import tpu as pltpu


# ---------------------------------------------------------------------------
# Tiling helpers
# ---------------------------------------------------------------------------
def _round_up(v, m):
    return (v + m - 1) // m * m


def _tile_plan(C, L):
    """Pick (Cp, tc, Lp, tl): padded sizes and tile sizes for C and L."""
    if C > 256:
        tc = 256                       # MXU-sized row/col tile
        cp = _round_up(C, tc)
    else:
        cp = _round_up(max(C, 8), 8)   # single full tile, sublane aligned
        tc = cp
    if L > 512:
        tl = 512                       # reduction (lag) tile, lane aligned
        lp = _round_up(L, tl)
    else:
        lp = _round_up(max(L, 128), 128)
        tl = lp
    return cp, tc, lp, tl


def _pad3(x, cp, lp):
    B, C, L = x.shape
    if C == cp and L == lp:
        return x
    return jnp.pad(x, ((0, 0), (0, cp - C), (0, lp - L)))


def _as_compute(x):
    """Keep bf16 / f32 as-is (MXU friendly); map everything else to f32."""
    x = jnp.asarray(x)
    if x.dtype in (jnp.bfloat16, jnp.float32):
        return x
    return x.astype(jnp.float32)


def _pair_maps(n_tiles):
    """Upper-triangular channel-tile pairs and their Frobenius weights."""
    ii, jj, ww = [], [], []
    for i in range(n_tiles):
        for j in range(i, n_tiles):
            ii.append(i)
            jj.append(j)
            ww.append(1.0 if i == j else 2.0)
    return (jnp.asarray(np.asarray(ii, np.int32)),
            jnp.asarray(np.asarray(jj, np.int32)),
            jnp.asarray(np.asarray(ww, np.float32)))


_VMEM_LIMIT = 32 * 1024 * 1024


# ---------------------------------------------------------------------------
# Kernels
# ---------------------------------------------------------------------------
def _gram_kernel(inv_l, xr_ref, xc_ref, g_ref, acc_ref):
    """G[b, i-tile, j-tile] = (sum_k xr @ xc^T) / L."""
    k = pl.program_id(3)

    @pl.when(k == 0)
    def _():
        acc_ref[...] = jnp.zeros_like(acc_ref)

    acc_ref[...] += jax.lax.dot_general(
        xr_ref[0], xc_ref[0],
        (((1,), (1,)), ((), ())),
        preferred_element_type=jnp.float32)

    @pl.when(k == pl.num_programs(3) - 1)
    def _():
        g_ref[0] = acc_ref[...] * inv_l


def _style_pair_kernel(inv_l, imap_ref, jmap_ref, xr_ref, xc_ref, t_ref,
                       o_ref, acc_ref):
    """Fused: Gram tile (accumulated over K) -> (G - T)^2 tile, one write.

    Only upper-triangular channel-tile pairs are visited (symmetry); the pair
    -> (i, j) mapping lives in SMEM via scalar prefetch and is consumed by the
    BlockSpec index_maps, not here.
    """
    k = pl.program_id(2)

    @pl.when(k == 0)
    def _():
        acc_ref[...] = jnp.zeros_like(acc_ref)

    acc_ref[...] += jax.lax.dot_general(
        xr_ref[0], xc_ref[0],
        (((1,), (1,)), ((), ())),
        preferred_element_type=jnp.float32)

    @pl.when(k == pl.num_programs(2) - 1)
    def _():
        d = acc_ref[...] * inv_l - t_ref[0]
        o_ref[0, 0] = d * d


# ---------------------------------------------------------------------------
# pallas_call wrappers
# ---------------------------------------------------------------------------
def gram_pallas(x):
    """Batched Gram matrices, returned padded to (B, Cp, Cp) in f32."""
    x = _as_compute(x)
    B, C, L = x.shape
    cp, tc, lp, tl = _tile_plan(C, L)
    xp = _pad3(x, cp, lp)
    grid = (B, cp // tc, cp // tc, lp // tl)
    kern = functools.partial(_gram_kernel, 1.0 / float(L))
    return pl.pallas_call(
        kern,
        out_shape=jax.ShapeDtypeStruct((B, cp, cp), jnp.float32),
        grid_spec=pltpu.PrefetchScalarGridSpec(
            num_scalar_prefetch=0,
            grid=grid,
            in_specs=[
                pl.BlockSpec((1, tc, tl), lambda b, i, j, k: (b, i, k)),
                pl.BlockSpec((1, tc, tl), lambda b, i, j, k: (b, j, k)),
            ],
            out_specs=pl.BlockSpec((1, tc, tc), lambda b, i, j, k: (b, i, j)),
            scratch_shapes=[pltpu.VMEM((tc, tc), jnp.float32)],
        ),
        compiler_params=pltpu.CompilerParams(
            dimension_semantics=("parallel", "parallel", "parallel",
                                 "arbitrary"),
            vmem_limit_bytes=_VMEM_LIMIT,
        ),
    )(xp, xp)


def style_sqdiff_pairs_pallas(x, target_gram_padded, imap, jmap, cp, tc):
    """(gram(x) - T)^2 for upper-triangular channel-tile pairs.

    Returns a (B, num_pairs, tc, tc) f32 slab; pads contribute zero.
    """
    x = _as_compute(x)
    B, C, L = x.shape
    _, _, lp, tl = _tile_plan(C, L)
    xp = _pad3(x, cp, lp)
    n_pairs = int(imap.shape[0])
    grid = (B, n_pairs, lp // tl)
    kern = functools.partial(_style_pair_kernel, 1.0 / float(L))
    return pl.pallas_call(
        kern,
        out_shape=jax.ShapeDtypeStruct((B, n_pairs, tc, tc), jnp.float32),
        grid_spec=pltpu.PrefetchScalarGridSpec(
            num_scalar_prefetch=2,
            grid=grid,
            in_specs=[
                pl.BlockSpec((1, tc, tl),
                             lambda b, p, k, im, jm: (b, im[p], k)),
                pl.BlockSpec((1, tc, tl),
                             lambda b, p, k, im, jm: (b, jm[p], k)),
                pl.BlockSpec((1, tc, tc),
                             lambda b, p, k, im, jm: (b, im[p], jm[p])),
            ],
            out_specs=pl.BlockSpec((1, 1, tc, tc),
                                   lambda b, p, k, im, jm: (b, p, 0, 0)),
            scratch_shapes=[pltpu.VMEM((tc, tc), jnp.float32)],
        ),
        compiler_params=pltpu.CompilerParams(
            dimension_semantics=("parallel", "parallel", "arbitrary"),
            vmem_limit_bytes=_VMEM_LIMIT,
        ),
    )(imap, jmap, xp, xp, target_gram_padded)


# ---------------------------------------------------------------------------
# Module-like wrappers (mirror the PyTorch API)
# ---------------------------------------------------------------------------
class GramMatrixPallas:
    def __call__(self, x):
        x = jnp.asarray(x)
        B, C, L = x.shape
        return gram_pallas(x)[:, :C, :C].astype(x.dtype)


class StyleLossPallas:
    """weight * ||gram(target) - gram(x)||_F / ||gram(target)||_F."""

    def __init__(self, target, weight=1.0):
        # NOTE: the reference module also constructs criterion=nn.MSELoss but
        # never uses it in forward, so it is intentionally not ported.
        self.weight = float(weight)
        target = jnp.asarray(target)
        B, C, L = target.shape
        self._B, self._C = int(B), int(C)
        self._cp, self._tc, _, _ = _tile_plan(C, L)
        # Pair enumeration (upper triangle of the channel-tile grid) + weights.
        self._imap, self._jmap, self._pair_w = _pair_maps(self._cp // self._tc)
        # Target Gram computed once at init with the Pallas matmul kernel; the
        # padded f32 layout is consumed directly by the fused loss kernel.
        self.target_gram_padded = gram_pallas(target)
        self.target = self.target_gram_padded[:, :C, :C]
        # ||T||_F is a constant of the module: precompute once.
        self._t_norm = jnp.sqrt(jnp.sum(self.target_gram_padded ** 2))

    def __call__(self, x):
        if self.weight == 0:
            return jnp.zeros((), jnp.float32)   # dtype-stable "0.0"
        x = jnp.asarray(x)
        assert x.ndim == 3 and x.shape[0] == self._B and x.shape[1] == self._C
        sq = style_sqdiff_pairs_pallas(x, self.target_gram_padded,
                                       self._imap, self._jmap,
                                       self._cp, self._tc)
        # Tiny final reduction + sqrt ratio done in XLA; off-diagonal pairs
        # counted twice (Gram symmetry), diagonal pairs once.
        diff_sq = jnp.sum(jnp.sum(sq, axis=(0, 2, 3)) * self._pair_w)
        return (self.weight * jnp.sqrt(diff_sq) / self._t_norm).astype(
            jnp.float32)


# ---------------------------------------------------------------------------
# Demo + numpy reference check
# ---------------------------------------------------------------------------
def _gram_np(a):
    a = np.asarray(a, np.float32)
    return np.matmul(a, np.transpose(a, (0, 2, 1))) / a.shape[2]


def _style_loss_np(target, x, weight):
    T = _gram_np(target)
    G = _gram_np(x)
    return float(weight * np.linalg.norm(T - G) / np.linalg.norm(T))


if __name__ == "__main__":
    key = jax.random.PRNGKey(0)
    k1, k2, k3, k4 = jax.random.split(key, 4)

    # --- Small case: single C tile, single L tile (B=2, C=4, H=W=16). ---
    B, C, H, W = 2, 4, 16, 16
    target = jax.random.normal(k1, (B, C, H * W), dtype=jnp.float32)
    x = jax.random.normal(k2, (B, C, H * W), dtype=jnp.float32)

    gram = GramMatrixPallas()
    g = jax.block_until_ready(gram(x))
    np.testing.assert_allclose(np.asarray(g), _gram_np(x), rtol=1e-3, atol=1e-4)

    mod = StyleLossPallas(target, weight=1.0)
    loss = jax.block_until_ready(mod(x))
    ref = _style_loss_np(target, x, 1.0)
    np.testing.assert_allclose(float(loss), ref, rtol=1e-3, atol=1e-5)

    # --- Larger case: multi-tile C (symmetric-pair path) + multi-step K. ---
    B2, C2, L2 = 2, 320, 640
    target2 = jax.random.normal(k3, (B2, C2, L2), dtype=jnp.float32)
    x2 = jax.random.normal(k4, (B2, C2, L2), dtype=jnp.float32)
    mod2 = StyleLossPallas(target2, weight=0.5)
    loss2 = jax.block_until_ready(mod2(x2))
    ref2 = _style_loss_np(target2, x2, 0.5)
    np.testing.assert_allclose(float(loss2), ref2, rtol=5e-3, atol=1e-5)

    print("KERNEL_OK")
</pallas_src>

<mosaic_0001>
module attributes {stable_mosaic.version = 11 : i64} {
  func.func @_gram_kernel(%arg0: i32, %arg1: i32, %arg2: i32, %arg3: i32, %arg4: memref<1x8x256xf32, #tpu.memory_space<vmem>>, %arg5: memref<1x8x256xf32, #tpu.memory_space<vmem>>, %arg6: memref<1x8x8xf32, #tpu.memory_space<vmem>>, %arg7: memref<8x8xf32, #tpu.memory_space<vmem>>) attributes {dimension_semantics = [#tpu.dimension_semantics<parallel>, #tpu.dimension_semantics<parallel>, #tpu.dimension_semantics<parallel>, #tpu.dimension_semantics<arbitrary>], iteration_bounds = array<i64: 2, 1, 1, 1>, scalar_prefetch = 0 : i64, scratch_operands = 1 : i64, tpu.core_type = #tpu.core_type<tc>, window_params = [{transform_indices = @transform_0, window_bounds = array<i64: 1, 8, 256>}, {transform_indices = @transform_1, window_bounds = array<i64: 1, 8, 256>}, {transform_indices = @transform_2, window_bounds = array<i64: 1, 8, 8>}]} {
    %c0_i32 = arith.constant 0 : i32
    %0 = arith.cmpi eq, %arg3, %c0_i32 : i32
    %1 = arith.extui %0 : i1 to i32
    %c0_i32_0 = arith.constant 0 : i32
    %2 = arith.cmpi ne, %1, %c0_i32_0 : i32
    scf.if %2 {
      %cst_12 = arith.constant 0.000000e+00 : f32
      %14 = vector.broadcast %cst_12 : f32 to vector<8x8xf32>
      %c0_13 = arith.constant 0 : index
      %c0_14 = arith.constant 0 : index
      %15 = vector.load %arg7[%c0_13, %c0_14] : memref<8x8xf32, #tpu.memory_space<vmem>>, vector<8x8xf32>
      tpu.vector_store %arg7[%c0_13, %c0_14], %14 {strides = array<i32>} : memref<8x8xf32, #tpu.memory_space<vmem>>, vector<8x8xf32>,
    } else {
    }
    %c0 = arith.constant 0 : index
    %c0_1 = arith.constant 0 : index
    %3 = vector.load %arg7[%c0, %c0_1] : memref<8x8xf32, #tpu.memory_space<vmem>>, vector<8x8xf32>
    %c0_2 = arith.constant 0 : index
    %c0_3 = arith.constant 0 : index
    %c0_4 = arith.constant 0 : index
    %4 = vector.load %arg4[%c0_2, %c0_3, %c0_4] : memref<1x8x256xf32, #tpu.memory_space<vmem>>, vector<1x8x256xf32>
    %5 = vector.shape_cast %4 : vector<1x8x256xf32> to vector<8x256xf32>
    %c0_5 = arith.constant 0 : index
    %c0_6 = arith.constant 0 : index
    %c0_7 = arith.constant 0 : index
    %6 = vector.load %arg5[%c0_5, %c0_6, %c0_7] : memref<1x8x256xf32, #tpu.memory_space<vmem>>, vector<1x8x256xf32>
    %7 = vector.shape_cast %6 : vector<1x8x256xf32> to vector<8x256xf32>
    %cst = arith.constant dense<0.000000e+00> : vector<8x8xf32>
    %8 = tpu.matmul %5, %7, %cst {dimension_numbers = #tpu.dot_dimension_numbers<[1], [1], [0], [0], [0, 0, 1, 0], [], []>} : vector<8x256xf32>, vector<8x256xf32>, vector<8x8xf32> -> vector<8x8xf32>
    %9 = arith.addf %3, %8 : vector<8x8xf32>
    %c0_8 = arith.constant 0 : index
    %c0_9 = arith.constant 0 : index
    %10 = vector.load %arg7[%c0_8, %c0_9] : memref<8x8xf32, #tpu.memory_space<vmem>>, vector<8x8xf32>
    tpu.vector_store %arg7[%c0_8, %c0_9], %9 {strides = array<i32>} : memref<8x8xf32, #tpu.memory_space<vmem>>, vector<8x8xf32>,
    %c0_i32_10 = arith.constant 0 : i32
    %11 = arith.cmpi eq, %arg3, %c0_i32_10 : i32
    %12 = arith.extui %11 : i1 to i32
    %c0_i32_11 = arith.constant 0 : i32
    %13 = arith.cmpi ne, %12, %c0_i32_11 : i32
    scf.if %13 {
      %c0_12 = arith.constant 0 : index
      %c0_13 = arith.constant 0 : index
      %14 = vector.load %arg7[%c0_12, %c0_13] : memref<8x8xf32, #tpu.memory_space<vmem>>, vector<8x8xf32>
      %cst_14 = arith.constant 3.906250e-03 : f32
      %15 = vector.broadcast %cst_14 : f32 to vector<8x8xf32>
      %16 = arith.mulf %14, %15 : vector<8x8xf32>
      %c0_15 = arith.constant 0 : index
      %c0_16 = arith.constant 0 : index
      %c0_17 = arith.constant 0 : index
      %17 = vector.load %arg6[%c0_15, %c0_16, %c0_17] : memref<1x8x8xf32, #tpu.memory_space<vmem>>, vector<1x8x8xf32>
      %18 = vector.shape_cast %17 : vector<1x8x8xf32> to vector<8x8xf32>
      %19 = vector.shape_cast %16 : vector<8x8xf32> to vector<1x8x8xf32>
      tpu.vector_store %arg6[%c0_15, %c0_16, %c0_17], %19 {strides = array<i32>} : memref<1x8x8xf32, #tpu.memory_space<vmem>>, vector<1x8x8xf32>,
    } else {
    }
    return
  }
  func.func @transform_0(%arg0: i32, %arg1: i32, %arg2: i32, %arg3: i32) -> (i32, i32, i32) {
    %c0_i32 = arith.constant 0 : i32
    return %arg0, %arg1, %arg3 : i32, i32, i32
  }
  func.func @transform_1(%arg0: i32, %arg1: i32, %arg2: i32, %arg3: i32) -> (i32, i32, i32) {
    %c0_i32 = arith.constant 0 : i32
    return %arg0, %arg2, %arg3 : i32, i32, i32
  }
  func.func @transform_2(%arg0: i32, %arg1: i32, %arg2: i32, %arg3: i32) -> (i32, i32, i32) {
    %c0_i32 = arith.constant 0 : i32
    return %arg0, %arg1, %arg2 : i32, i32, i32
  }
}

</mosaic_0001>

<bundles_post_ra>
// kernel: tpu_custom_call.1
= control target key start
LH: loop header
LB: loop body
LE: loop exit
PB: predicated region body
PF: predicated region fallthrough
CT: control target
= control target key end

     0   :  { %7 = vsyncpa [#allocation4], 0  ;;  %s950_s0 = inlined_call_operand.hbm [shape: f32[2,8,256], index: 0, kind: input, shape index: {}]   ;;  %s951_s1 = inlined_call_operand.hbm [shape: f32[2,8,256], index: 1, kind: input, shape index: {}]   ;;  %s952_s2 = inlined_call_operand.hbm [shape: f32[2,8,8], index: 2, kind: output, shape index: {}]  }
   0x1   :  { %9 = vsyncpa [#allocation4 + $0x1], 0 }
   0x2   :  { %10 = vsyncpa [#allocation7], 0 }
   0x3   :  { %12 = vsyncpa [#allocation7 + $0x1], 0 }
   0x4   :  { %13 = vsyncpa [#allocation5], 0 }
   0x5   :  { %15 = vsyncpa [#allocation5 + $0x1], 0  ;;  %s726_s9 = smov 0   ;;  %s728_s10 = smov 0  }
   0x6   :  { %s730_s11 = smov 0   ;;  %s732_s12 = smov 0  }
   0x7   :  { %s734_s13 = smov 0   ;;  %s736_s14 = smov 0  }
   0x8 LB: > { %s471_s15 = sadd.s32 4294967295, %s705_s14   ;;  %s472_s16 = sadd.s32 4294967294, %s705_s14   ;;  %s705_s14 = sphi %s736_s14, %s21_s14   ;;  %s701_s13 = sphi %s734_s13, %s972_s13   ;;  %s697_s12 = sphi %s732_s12, %s971_s12   ;;  %s693_s11 = sphi %s730_s11, %s970_s11   ;;  %s689_s10 = sphi %s728_s10, %s969_s10   ;;  %s685_s9 = sphi %s726_s9, %s968_s9  }
   0x9   : > { %s47_s17 = sadd.s32 1, %s701_s13  ;;  %s58_s18 = sadd.s32 1, %s693_s11 }
   0xa   : > { %p49_p0 = scmp.ge.s32.totalorder %s47_s17, 2  ;;  %p65_p1 = scmp.ne.s32.totalorder %s693_s11, %s689_s10 }
   0xb   : > { %p66_p2 = scmp.eq.s32.totalorder %s705_s14, 0  ;;  %p71_p3 = scmp.ne.s32.totalorder %s689_s10, %s685_s9 }
   0xc   : > { %s974_s17 = smov (%p49_p0, %s47_s17), 0  ;;  %p72_p5 = scmp.eq.s32.totalorder %s471_s15, 0 }
   0xd   : > { %p767_p4 = por %p66_p2, %p65_p1  ;;  %s51_s20 = ssub.s32 %s701_s13, %s974_s17 }
   0xe   : > { %p129_p6 = scmp.eq.s32.totalorder %s471_s15, 1  ;;  %p56_p7 = scmp.eq.s32.totalorder %s51_s20, 0 }
   0xf   : > { %p773_p8 = por %p72_p5, %p71_p3  ;;  %p135_p10 = scmp.eq.s32.totalorder %s472_s16, 1 }
  0x10   : > { %p777_p9 = por %p129_p6, %p65_p1  ;;  %p508_p13 = scmp.lt.s32.totalorder %s705_s14, 2 }
  0x11   : > { %s956_s21 = scalar_select %p773_p8, 1, 0 }
  0x12   : > { %s957_s22 = scalar_select %p777_p9, 1, 0 }
  0x13   : > { %s782_s23 = scalar_select %p56_p7, %s693_s11, %s58_s18  }
  0x14   : > { %p784_p11 = por %p135_p10, %p71_p3  ;;  %s791_s25 = sand.u32 1, %s693_s11  }
  0x15   : > { %s475_s26 = sshll.u32 %s791_s25, 4  ;;  %s489_s27 = sshll.u32 %s701_s13, 8 }
  0x16   : > { %s958_s24 = scalar_select %p784_p11, 1, 0 }
  0x17   : > { %s800_s30 = scalar_lea.hbm %s950_s0, %s489_s27  ;;  %s159_s3 = scalar_lea.vmem [#allocation3], %s475_s26 }
  0x18   : > { %s171_s4 = sshll.u32 %s159_s3, 4  ;;  %p808_p0 = pnand %p508_p13, %p767_p4  ;;  %s804_s4 = int_to_ptr.vmem [resolvable:$true] %s171_s4 }
  0x19   : > { %s156_s6 = scalar_lea.sflag [#allocation4], %s791_s25  ;;  %s559_s7 = scalar_lea.hbm %s800_s30, 256 }
  0x1a   : > { %p560_p3 = scmp.ne.s32.totalorder %s800_s30, %s559_s7  ;;  %p561_p5 = pneg %p808_p0 }
  0x1b   : > { %s564_s16 = scalar_lea.hbm %s950_s0, 512  ;;  %p565_p4 = scmp.lt.u32.totalorder %s800_s30, %s950_s0 }
  0x1c   : > { %p562_p6 = pnand %p561_p5, %p560_p3  ;;  %p566_p10 = scmp.lt.u32.totalorder %s564_s16, %s559_s7 }
  0x1d   : > { %p568_p12 = scmp.lt.u32.totalorder %s559_s7, %s800_s30 }
  0x1e   : > { %p563_p7 = pneg %p562_p6  ;;  %p567_p13 = por %p566_p10, %p565_p4 }
  0x20   : > { %p569_p1 = por %p568_p12, %p567_p13 }
  0x22   : > { %p570_p2 = pnand %p569_p1, %p563_p7 }
  0x24   : > { %573 = shalt.err (!%p570_p2)
}
  0x25   : > { %s574_s20 = scalar_lea.vmem %s804_s4, 256  ;;  %s707_s28 = smov [#allocation3]  }
  0x26   : > { %p575_p3 = scmp.ne.s32.totalorder %s804_s4, %s574_s20  ;;  %s579_s29 = sshll.u32 %s707_s28, 4  ;;  %s580_s29 = int_to_ptr.vmem [resolvable:$false] %s579_s29 }
  0x27   : > { %s581_s3 = scalar_lea.vmem %s580_s29, 512  ;;  %p582_p9 = scmp.lt.s32.totalorder %s804_s4, %s580_s29 }
  0x28   : > { %p577_p6 = pnand %p575_p3, %p561_p5  ;;  %p583_p4 = scmp.lt.s32.totalorder %s581_s3, %s574_s20 }
  0x2a   : > { %p578_p11 = pneg %p577_p6  ;;  %p584_p10 = por %p583_p4, %p582_p9 }
  0x2c   : > { %p585_p12 = pnand %p584_p10, %p578_p11 }
  0x2e   : > { %588 = shalt.err (!%p585_p12)
}
  0x2f   : > { %500 = dma.hbm_to_vmem [thread:$0]  (!%p808_p0), %s800_s30, 256, %s804_s4, %s156_s6  }
  0x30   : > { %p960_p1 = scmp.lt.s32.totalorder %s705_s14, 3  ;;  %p961_p2 = scmp.ge.s32.totalorder %s705_s14, 1 }
  0x31   : > { %s853_s16 = scalar_lea.hbm %s951_s1, %s489_s27  ;;  %s182_s18 = scalar_lea.vmem [#allocation6], %s475_s26 }
  0x32   : > { %p844_p7 = pnand %p961_p2, %p960_p1  ;;  %s194_s19 = sshll.u32 %s182_s18, 4  ;;  %s195_s19 = int_to_ptr.vmem [resolvable:$true] %s194_s19 }
  0x33   : > { %s179_s30 = scalar_lea.sflag [#allocation7], %s791_s25  ;;  %s589_s4 = scalar_lea.hbm %s853_s16, 256 }
  0x34   : > { %s962_s7 = scalar_select %p844_p7, 1, 0 }
  0x35   : > { %p590_p9 = scmp.ne.s32.totalorder %s853_s16, %s589_s4  ;;  %s594_s27 = scalar_lea.hbm %s951_s1, 512 }
  0x36   : > { %p595_p3 = scmp.lt.u32.totalorder %s853_s16, %s951_s1  ;;  %p596_p6 = scmp.lt.u32.totalorder %s594_s27, %s589_s4 }
  0x37   : > { %p592_p11 = pnand %p590_p9, %p561_p5  ;;  %p598_p10 = scmp.lt.u32.totalorder %s589_s4, %s853_s16 }
  0x38   : > { %p597_p4 = por %p596_p6, %p595_p3 }
  0x39   : > { %p593_p13 = pneg %p592_p11 }
  0x3a   : > { %p599_p12 = por %p598_p10, %p597_p4 }
  0x3c   : > { %p600_p1 = pnand %p599_p12, %p593_p13 }
  0x3e   : > { %603 = shalt.err (!%p600_p1)
}
  0x3f   : > { %s604_s25 = scalar_lea.vmem %s195_s19, 256  ;;  %s708_s26 = smov [#allocation6]  }
  0x40   : > { %p605_p2 = scmp.ne.s32.totalorder %s195_s19, %s604_s25  ;;  %s609_s3 = sshll.u32 %s708_s26, 4  ;;  %s610_s3 = int_to_ptr.vmem [resolvable:$false] %s609_s3 }
  0x41   : > { %s611_s8 = scalar_lea.vmem %s610_s3, 512  ;;  %p612_p8 = scmp.lt.s32.totalorder %s195_s19, %s610_s3 }
  0x42   : > { %p607_p9 = pnand %p605_p2, %p561_p5  ;;  %p613_p7 = scmp.lt.s32.totalorder %s611_s8, %s604_s25 }
  0x44   : > { %p608_p11 = pneg %p607_p9  ;;  %p614_p3 = por %p613_p7, %p612_p8 }
  0x46   : > { %p615_p6 = pnand %p614_p3, %p608_p11 }
  0x48   : > { %618 = shalt.err (!%p615_p6)
}
  0x49   : > { %503 = dma.hbm_to_vmem [thread:$0]  (!%p808_p0), %s853_s16, 256, %s195_s19, %s179_s30  }
  0x4a   : > { %p963_p13 = scmp.ne.s32.totalorder %s962_s7, 0 }
  0x4b   : > { %s880_s15 = sand.u32 (!%p963_p13), 1, %s689_s10   ;;  %p964_p5 = scmp.ne.s32.totalorder (!%p963_p13), %s956_s21, 0 }
  0x4c   : > { %203 = sbr.rel (%p963_p13) target bundleno = 329 (0x149), region = 28  ;;  %s482_s18 = sshll.u32 (!%p963_p13), %s880_s15, 4 }
  0x4d   : > { %s206_s4 = scalar_lea.sflag (!%p963_p13), [#allocation4], %s880_s15  ;;  %s209_s6 = scalar_lea.vmem (!%p963_p13), [#allocation3], %s482_s18 }
  0x53   : > { %672 = dma.done.wait (%p964_p5), %s206_s4, 256  }
  0x54   : > { %674 = vsyncadd (%p964_p5), %s206_s4, 4294967040  ;;  %s215_s5 = scalar_lea.sflag [#allocation7], %s880_s15  ;;  %s218_s16 = scalar_lea.vmem [#allocation6], %s482_s18 }
  0x55   : > { %676 = dma.done.wait (%p964_p5), %s215_s5, 256  }
  0x56   : > { %678 = vsyncadd (%p964_p5), %s215_s5, 4294967040  ;;  %vm250_vm0 = vcmask 64512   ;;  %v709_v0 = vmov 0.0   ;;  %v256_v1 = vld [vmem:[%s218_s16 + $0x8] sm:$0xff]  ;;  %v255_v2 = vld [vmem:[%s218_s16] sm:$0xff]  ;;  %s484_s21 = sshll.u32 %s880_s15, 3 }
  0x57   : > { %251 = vst.msk [vmem:[#allocation2] sm:$0xff] %vm250_vm0, %v709_v0  ;;  %v254_v3 = vld [vmem:[%s209_s6 + $0x8] sm:$0xff]  ;;  %257 = vmatprep.subr.mxu0 %v256_v1  ;;  %v253_v4 = vld [vmem:[%s209_s6] sm:$0xff]  ;;  %s486_s7 = sshll.u32 %s697_s12, 7  ;;  %s243_s19 = scalar_lea.vmem [#allocation8], %s484_s21 }
  0x58   : > { %321 = vmatprep.mubr.f32.mxu0 %v254_v3  ;;  %258 = vmatpush1.xpose.msra.mxu0 %v255_v2  ;;  %s352_s30 = sshll.u32 %s243_s19, 4  ;;  %s900_s28 = scalar_lea.hbm %s952_s2, %s486_s7  ;;  %s902_s30 = int_to_ptr.vmem [resolvable:$true] %s352_s30 }
  0x59   : > { %s337_s29 = scalar_lea.sflag [#allocation5], %s880_s15  ;;  %s619_s25 = scalar_lea.vmem %s902_s30, 128 }
  0x5a   : > { %p620_p8 = scmp.ne.s32.totalorder %s902_s30, %s619_s25  ;;  %p965_p0 = scmp.ne.s32.totalorder %s957_s22, 0 }
  0x5b   : > { %322 = vmatmul.mubr.f32.vlgmr.msra.gmra.mrb[0].mxu0 %v253_v4  ;;  %s710_s12 = smov [#allocation8]  }
  0x5c   : > { %p621_p7 = pnand %p620_p8, %p965_p0  ;;  %s623_s26 = sshll.u32 %s710_s12, 4  ;;  %s624_s26 = int_to_ptr.vmem [resolvable:$false] %s623_s26 }
  0x5d   : > { %s625_s3 = scalar_lea.vmem %s624_s26, 256  ;;  %p626_p10 = scmp.lt.s32.totalorder %s902_s30, %s624_s26 }
  0x5e   : > { %v252_v5 = vld [vmem:[#allocation2] sm:$0xff]  ;;  %p622_p4 = pneg %p621_p7  ;;  %p627_p12 = scmp.lt.s32.totalorder %s625_s3, %s619_s25 }
  0x60   : > { %p628_p1 = por %p627_p12, %p626_p10 }
  0x62   : > { %p629_p2 = pnand %p628_p1, %p622_p4 }
 0x12e   : > { %v323_v6 = vpop.f32.mrb[0].mxu0 }
 0x12f   : > { %v327_v7 = vadd.f32 %v323_v6, %v252_v5  ;;  %v325_v8 = vpop.f32.mrb[1].mxu0 }
 0x131   : > { %329 = vst.msk [vmem:[#allocation2] sm:$0xff] %vm250_vm0, %v327_v7 }
 0x138   : > { %v333_v9 = vld [vmem:[#allocation2] sm:$0xff] }
 0x139   : > { %v334_v10 = vmul.f32 0.00390625, %v333_v9 }
 0x13b   : > { %335 = vst.msk [vmem:[%s243_s19] sm:$0xff] %vm250_vm0, %v334_v10 }
 0x13c   : > { %632 = shalt.err (!%p629_p2)
}
 0x13d   : > { %s633_s8 = scalar_lea.hbm %s900_s28, 128  ;;  %s637_s4 = scalar_lea.hbm %s952_s2, 256 }
 0x13e   : > { %p634_p9 = scmp.ne.s32.totalorder %s900_s28, %s633_s8  ;;  %p638_p6 = scmp.lt.u32.totalorder %s900_s28, %s952_s2 }
 0x13f   : > { %p639_p13 = scmp.lt.u32.totalorder %s637_s4, %s633_s8  ;;  %p641_p8 = scmp.lt.u32.totalorder %s633_s8, %s900_s28 }
 0x140   : > { %p635_p11 = pnand %p634_p9, %p965_p0 }
 0x141   : > { %p640_p5 = por %p639_p13, %p638_p6 }
 0x142   : > { %p636_p3 = pneg %p635_p11 }
 0x143   : > { %p642_p7 = por %p641_p8, %p640_p5 }
 0x145   : > { %p643_p4 = pnand %p642_p7, %p636_p3 }
 0x147   : > { %646 = shalt.err (!%p643_p4)
}
 0x148   : > { %495 = dma.vmem_to_hbm [thread:$0]  (%p965_p0), %s902_s30, 128, %s900_s28, %s337_s29  }
 0x149 PF: > { %s364_s16 = sand.u32 1, %s685_s9   ;;  %p966_p10 = scmp.ne.s32.totalorder %s958_s24, 0 }
 0x14a   : > { %p967_p12 = scmp.ge.s32.totalorder %s705_s14, 2  ;;  %s365_s21 = scalar_lea.sflag [#allocation5], %s364_s16 }
 0x14c   : > { %p505_p1 = pnand %p967_p12, %p966_p10 }
 0x14e   : > { %680 = dma.done.wait (!%p505_p1), %s365_s21, 128  }
 0x14f   : > { %682 = vsyncadd (!%p505_p1), %s365_s21, 4294967168  ;;  %s21_s14 = sadd.s32 1, %s705_s14   ;;  %s968_s9 = smov %s689_s10 }
 0x150   : > { %p18_p2 = scmp.ge.s32.totalorder %s21_s14, 4   ;;  %s969_s10 = smov %s693_s11 }
 0x151   : > { %s970_s11 = smov %s782_s23  ;;  %s971_s12 = smov %s701_s13 }
 0x152   : > { %s972_s13 = smov %s974_s17  ;;  %20 = sbr.rel (!%p18_p2) target bundleno = 8 (0x8), region = 94 }
 0x159   :  { %370 = vsyncpa [#allocation4], 1 }
 0x15a   :  { %372 = vsyncpa [#allocation4 + $0x1], 1 }
 0x15b   :  { %373 = vsyncpa [#allocation7], 1 }
 0x15c   :  { %375 = vsyncpa [#allocation7 + $0x1], 1 }
 0x15d   :  { %376 = vsyncpa [#allocation5], 1 }
 0x15e   :  { %378 = vsyncpa [#allocation5 + $0x1], 1 }

</bundles_post_ra>
